<compile_context>
chip_gen: v6e
topology: v6e:2x2x1
jax: 0.10.0
libtpu: 0.0.40
codegen_flags: <defaults>
</compile_context>

<pallas_src>
import functools

import jax
import jax.numpy as jnp
from jax.experimental import pallas as pl
from jax.experimental.pallas import tpu as pltpu


# --------------------------------------------------------------------------- #
# Generation-aware tile defaults.
# --------------------------------------------------------------------------- #
def _default_tiles():
    try:
        big_vmem = pltpu.get_tpu_info().vmem_capacity_bytes >= (100 << 20)
    except Exception:  # noqa: BLE001 - fall back to v7x-safe (64 MiB VMEM) sizes
        big_vmem = False
    return {
        "row_tile": 8192 if big_vmem else 4096,      # (tr,128) f32 = 4 / 2 MiB
        "class_tile": 2048 if big_vmem else 1024,
        "batch_tile": 256,
    }


def _pick_class_tile(num_classes, class_tile):
    """Lane-aligned class tile; prefer one that divides C so no mask is needed."""
    class_tile = max(128, (class_tile // 128) * 128)
    if num_classes <= class_tile:
        return num_classes, False            # single full-extent block, no mask
    cand = class_tile
    while cand >= max(128, class_tile // 2):
        if num_classes % cand == 0:
            return cand, False               # exact tiling -> mask statically skipped
        cand -= 128
    return class_tile, True


def _pick_row_tile(rows, row_tile):
    """Sublane-aligned row tile; prefer an exact 2-core x tile split (no mask)."""
    row_tile = max(8, (row_tile // 8) * 8)
    if rows <= row_tile:
        return rows                          # single full-extent tile
    cand = row_tile
    while cand >= max(8, row_tile // 2):
        if rows % (2 * cand) == 0:
            return cand                      # exact split -> mask statically skipped
        cand -= 8
    return row_tile


# --------------------------------------------------------------------------- #
# Cross entropy: per-row NLL with online logsumexp over class tiles.
# Grid = (batch_tiles ["parallel"], class_tiles ["arbitrary"]).
# --------------------------------------------------------------------------- #
def _ce_kernel(logits_ref, targets_ref, nll_ref, m_ref, l_ref, t_ref, *,
               num_classes, mask_classes):
    c = pl.program_id(1)
    tc = logits_ref.shape[1]

    @pl.when(c == 0)
    def _():
        m_ref[...] = jnp.full_like(m_ref, -jnp.inf)
        l_ref[...] = jnp.zeros_like(l_ref)
        t_ref[...] = jnp.zeros_like(t_ref)

    x = logits_ref[...].astype(jnp.float32)                          # (TB, tc)
    cls = c * tc + jax.lax.broadcasted_iota(jnp.int32, x.shape, 1)   # global class id
    if mask_classes:  # statically skipped when C % tc == 0
        x = jnp.where(cls < num_classes, x, -jnp.inf)

    # Online logsumexp update (per row).
    m_old = m_ref[...]
    m_new = jnp.maximum(m_old, jnp.max(x, axis=-1, keepdims=True))
    l_ref[...] = (jnp.exp(m_old - m_new) * l_ref[...]
                  + jnp.sum(jnp.exp(x - m_new), axis=-1, keepdims=True))
    m_ref[...] = m_new

    # Target-logit gather: the target class falls in exactly one class tile.
    onehot = cls == targets_ref[...]
    t_ref[...] += jnp.sum(jnp.where(onehot, x, 0.0), axis=-1, keepdims=True)

    @pl.when(c == pl.num_programs(1) - 1)
    def _():
        nll_ref[...] = m_ref[...] + jnp.log(l_ref[...]) - t_ref[...]   # (TB, 1)


def _cross_entropy_nll(logits, targets, *, class_tile, batch_tile):
    B, C = logits.shape
    tc, mask_classes = _pick_class_tile(C, class_tile)
    batch_tile = max(8, (batch_tile // 8) * 8)
    tb = B if B <= batch_tile else batch_tile
    n_bt = pl.cdiv(B, tb)
    n_ct = pl.cdiv(C, tc)
    targets2d = targets.astype(jnp.int32).reshape(B, 1)

    kernel = functools.partial(_ce_kernel, num_classes=C,
                               mask_classes=mask_classes)
    # Garbage rows of a ragged last batch tile stay row-local and are dropped on
    # writeback (the (B,1) output simply has no slot for them).
    nll_rows = pl.pallas_call(
        kernel,
        out_shape=jax.ShapeDtypeStruct((B, 1), jnp.float32),
        grid=(n_bt, n_ct),
        in_specs=[pl.BlockSpec((tb, tc), lambda b, c: (b, c)),
                  pl.BlockSpec((tb, 1), lambda b, c: (b, 0))],
        out_specs=pl.BlockSpec((tb, 1), lambda b, c: (b, 0)),
        scratch_shapes=[pltpu.VMEM((tb, 1), jnp.float32),   # running max
                        pltpu.VMEM((tb, 1), jnp.float32),   # running sum-exp
                        pltpu.VMEM((tb, 1), jnp.float32)],  # target logit
        compiler_params=pltpu.CompilerParams(
            dimension_semantics=("parallel", "arbitrary")),
    )(logits, targets2d)
    return jnp.sum(nll_rows) / B


# --------------------------------------------------------------------------- #
# MAP prior: streaming sum((params - loc)^2), 2-core split + tiled reduction.
# Grid = (core_split ["parallel"], row_tiles ["arbitrary"]).
# --------------------------------------------------------------------------- #
def _prior_kernel(params_ref, loc_ref, out_ref, acc_ref, *, rows, per_core,
                  mask_rows):
    c = pl.program_id(0)
    t = pl.program_id(1)

    @pl.when(t == 0)
    def _():
        acc_ref[...] = jnp.zeros_like(acc_ref)

    d = params_ref[...].astype(jnp.float32) - loc_ref[...].astype(jnp.float32)
    d2 = d * d
    tr = d2.shape[0]
    if mask_rows:  # statically skipped when the 2-core x tile split is exact
        row = ((c * per_core + t) * tr
               + jax.lax.broadcasted_iota(jnp.int32, d2.shape, 0))
        d2 = jnp.where(row < rows, d2, 0.0)

    # Lane/sublane-local accumulation into one vreg-sized (8,128) scratch:
    # identical VALU add count to a (tr,128) accumulator, 4 KiB instead of MiBs.
    acc_ref[...] += jnp.sum(d2.reshape(tr // 8, 8, 128), axis=0)

    @pl.when(t == pl.num_programs(1) - 1)
    def _():
        out_ref[...] = acc_ref[...].reshape(1, 8, 128)   # per-core partial


def _map_prior_ssq(params, loc, *, row_tile):
    """sum((params - loc)^2) streamed through a tiled, 2-core Pallas reduction."""
    P = params.shape[0]
    main = (P // 1024) * 1024          # (8,128)-aligned prefix -> zero-copy reshape
    rows = main // 128                 # multiple of 8

    # <1024-element ragged tail handled as a cheap host-side scalar correction
    # (replaces the old jnp.pad, which rewrote both full arrays through HBM).
    if main < P:
        dt = params[main:].astype(jnp.float32) - loc[main:].astype(jnp.float32)
        tail_ss = jnp.sum(dt * dt)
    else:
        tail_ss = jnp.float32(0.0)
    if rows == 0:
        return tail_ss

    p2d = (params if main == P else params[:main]).reshape(rows, 128)
    l2d = (loc if main == P else loc[:main]).reshape(rows, 128)

    tr = _pick_row_tile(rows, row_tile)
    nt = pl.cdiv(rows, tr)
    n_split = 2 if nt >= 2 else 1                 # engage both v7x TensorCores
    per_core = pl.cdiv(nt, n_split)
    mask_rows = (n_split * per_core * tr != rows)

    def idx(c, t):
        # Clamp so a core's over-allocated last step re-reads a valid tile; its
        # contribution is zeroed by the in-kernel row mask.
        return (jnp.minimum(c * per_core + t, nt - 1), 0)

    kernel = functools.partial(_prior_kernel, rows=rows, per_core=per_core,
                               mask_rows=mask_rows)
    partials = pl.pallas_call(
        kernel,
        out_shape=jax.ShapeDtypeStruct((n_split, 8, 128), jnp.float32),
        grid=(n_split, per_core),
        in_specs=[pl.BlockSpec((tr, 128), idx),
                  pl.BlockSpec((tr, 128), idx)],
        out_specs=pl.BlockSpec((1, 8, 128), lambda c, t: (c, 0, 0)),
        scratch_shapes=[pltpu.VMEM((8, 128), jnp.float32)],
        compiler_params=pltpu.CompilerParams(
            dimension_semantics=("parallel", "arbitrary")),
    )(p2d, l2d)
    return jnp.sum(partials) + tail_ss


# --------------------------------------------------------------------------- #
# Public entry point: MAPAdaptationCELoss.forward
# --------------------------------------------------------------------------- #
def map_adaptation_ce_loss(logits, targets, N, params, loc, weight_decay,
                           *, class_tile=None, row_tile=None, batch_tile=None):
    """Pallas implementation of MAPAdaptationCELoss.forward."""
    del N  # present in the PyTorch signature; unused by forward
    defaults = _default_tiles()
    class_tile = defaults["class_tile"] if class_tile is None else class_tile
    row_tile = defaults["row_tile"] if row_tile is None else row_tile
    batch_tile = defaults["batch_tile"] if batch_tile is None else batch_tile

    B = logits.shape[0]
    nll = _cross_entropy_nll(logits, targets, class_tile=class_tile,
                             batch_tile=batch_tile)
    ssq = _map_prior_ssq(params, loc, row_tile=row_tile)
    prior = jnp.clip((1.0 / B) * (float(weight_decay) * 0.5) * ssq, -1e20, 1e20)
    return {"loss": nll + prior, "nll": nll, "prior": prior}


# --------------------------------------------------------------------------- #
# Pure-JAX reference + demo.
# --------------------------------------------------------------------------- #
def _reference(logits, targets, params, loc, weight_decay):
    logp = jax.nn.log_softmax(logits.astype(jnp.float32), axis=-1)
    nll = -jnp.mean(logp[jnp.arange(logits.shape[0]), targets])
    d = params.astype(jnp.float32) - loc.astype(jnp.float32)
    prior = (1.0 / logits.shape[0]) * (weight_decay / 2.0) * jnp.sum(d * d)
    prior = jnp.clip(prior, -1e20, 1e20)
    return {"loss": nll + prior, "nll": nll, "prior": prior}


if __name__ == "__main__":
    key = jax.random.PRNGKey(0)

    # Small configs exercising: tiled vs full-extent class dims (masked and
    # unmasked), ragged vs exact batch tiles, 2-core prior split (masked and
    # exact), single-tile prior, non-128-aligned P (host tail correction), and
    # bf16 params widened in-kernel.
    configs = [
        dict(B=8, C=384, P=31 * 128, wd=0.05, pdt=jnp.float32,
             kwargs=dict(class_tile=128, batch_tile=8, row_tile=16)),
        dict(B=20, C=320, P=5000, wd=0.11, pdt=jnp.bfloat16,
             kwargs=dict(class_tile=128, batch_tile=8, row_tile=8)),
        dict(B=2, C=40, P=4173, wd=1.3, pdt=jnp.float32,
             kwargs=dict()),
    ]

    N = 100  # present in the PyTorch signature; unused in forward
    for i, cfg in enumerate(configs):
        key, kl, kt, kp, kc = jax.random.split(key, 5)
        B, C, P = cfg["B"], cfg["C"], cfg["P"]
        logits = jax.random.normal(kl, (B, C), dtype=jnp.float32)
        targets = jax.random.randint(kt, (B,), 0, C, dtype=jnp.int32)
        loc = jax.random.normal(kc, (P,), dtype=cfg["pdt"])
        params = (loc.astype(jnp.float32)
                  + 0.1 * jax.random.normal(kp, (P,), dtype=jnp.float32)
                  ).astype(cfg["pdt"])

        out = map_adaptation_ce_loss(logits, targets, N, params, loc, cfg["wd"],
                                     **cfg["kwargs"])
        jax.block_until_ready(out)

        ref = _reference(logits, targets, params, loc, cfg["wd"])
        for k in ("loss", "nll", "prior"):
            assert jnp.allclose(out[k], ref[k], rtol=2e-5, atol=2e-5), (
                i, k, out[k], ref[k])

    print("KERNEL_OK")
</pallas_src>

<mosaic_0001>
module attributes {stable_mosaic.version = 11 : i64} {
  func.func @_ce_kernel(%arg0: i32, %arg1: i32, %arg2: memref<8x128xf32, #tpu.memory_space<vmem>>, %arg3: memref<8x1xi32, #tpu.memory_space<vmem>>, %arg4: memref<8x1xf32, #tpu.memory_space<vmem>>, %arg5: memref<8x1xf32, #tpu.memory_space<vmem>>, %arg6: memref<8x1xf32, #tpu.memory_space<vmem>>, %arg7: memref<8x1xf32, #tpu.memory_space<vmem>>) attributes {dimension_semantics = [#tpu.dimension_semantics<parallel>, #tpu.dimension_semantics<arbitrary>], iteration_bounds = array<i64: 1, 3>, scalar_prefetch = 0 : i64, scratch_operands = 3 : i64, tpu.core_type = #tpu.core_type<tc>, window_params = [{transform_indices = @transform_0, window_bounds = array<i64: 8, 128>}, {transform_indices = @transform_1, window_bounds = array<i64: 8, 1>}, {transform_indices = @transform_2, window_bounds = array<i64: 8, 1>}]} {
    %c0_i32 = arith.constant 0 : i32
    %0 = arith.cmpi eq, %arg1, %c0_i32 : i32
    %1 = arith.extui %0 : i1 to i32
    %c0_i32_0 = arith.constant 0 : i32
    %2 = arith.cmpi ne, %1, %c0_i32_0 : i32
    scf.if %2 {
      %cst_20 = arith.constant 0xFF800000 : f32
      %37 = vector.broadcast %cst_20 : f32 to vector<8x1xf32>
      %c0_21 = arith.constant 0 : index
      %c0_22 = arith.constant 0 : index
      %38 = vector.load %arg5[%c0_21, %c0_22] : memref<8x1xf32, #tpu.memory_space<vmem>>, vector<8x1xf32>
      tpu.vector_store %arg5[%c0_21, %c0_22], %37 {strides = array<i32>} : memref<8x1xf32, #tpu.memory_space<vmem>>, vector<8x1xf32>,
      %cst_23 = arith.constant 0.000000e+00 : f32
      %39 = vector.broadcast %cst_23 : f32 to vector<8x1xf32>
      %c0_24 = arith.constant 0 : index
      %c0_25 = arith.constant 0 : index
      %40 = vector.load %arg6[%c0_24, %c0_25] : memref<8x1xf32, #tpu.memory_space<vmem>>, vector<8x1xf32>
      tpu.vector_store %arg6[%c0_24, %c0_25], %39 {strides = array<i32>} : memref<8x1xf32, #tpu.memory_space<vmem>>, vector<8x1xf32>,
      %cst_26 = arith.constant 0.000000e+00 : f32
      %41 = vector.broadcast %cst_26 : f32 to vector<8x1xf32>
      %c0_27 = arith.constant 0 : index
      %c0_28 = arith.constant 0 : index
      %42 = vector.load %arg7[%c0_27, %c0_28] : memref<8x1xf32, #tpu.memory_space<vmem>>, vector<8x1xf32>
      tpu.vector_store %arg7[%c0_27, %c0_28], %41 {strides = array<i32>} : memref<8x1xf32, #tpu.memory_space<vmem>>, vector<8x1xf32>,
    } else {
    }
    %c0 = arith.constant 0 : index
    %c0_1 = arith.constant 0 : index
    %3 = vector.load %arg2[%c0, %c0_1] : memref<8x128xf32, #tpu.memory_space<vmem>>, vector<8x128xf32>
    %c128_i32 = arith.constant 128 : i32
    %4 = arith.muli %arg1, %c128_i32 : i32
    %5 = tpu.iota {dimensions = array<i32: 1>} : vector<8x128xi32>
    %6 = vector.broadcast %4 : i32 to vector<8x128xi32>
    %7 = arith.addi %6, %5 : vector<8x128xi32>
    %c0_2 = arith.constant 0 : index
    %c0_3 = arith.constant 0 : index
    %8 = vector.load %arg5[%c0_2, %c0_3] : memref<8x1xf32, #tpu.memory_space<vmem>>, vector<8x1xf32>
    %cst = arith.constant dense<0xFF800000> : vector<8xf32>
    %9 = vector.multi_reduction <maximumf>, %3, %cst [1] : vector<8x128xf32> to vector<8xf32>
    %10 = vector.shape_cast %9 : vector<8xf32> to vector<8x1xf32>
    %11 = arith.maximumf %8, %10 : vector<8x1xf32>
    %12 = arith.subf %8, %11 : vector<8x1xf32>
    %13 = math.exp %12 : vector<8x1xf32>
    %c0_4 = arith.constant 0 : index
    %c0_5 = arith.constant 0 : index
    %14 = vector.load %arg6[%c0_4, %c0_5] : memref<8x1xf32, #tpu.memory_space<vmem>>, vector<8x1xf32>
    %15 = arith.mulf %13, %14 : vector<8x1xf32>
    %16 = vector.broadcast %11 : vector<8x1xf32> to vector<8x128xf32>
    %17 = arith.subf %3, %16 : vector<8x128xf32>
    %18 = math.exp %17 : vector<8x128xf32>
    %cst_6 = arith.constant dense<0.000000e+00> : vector<8xf32>
    %19 = vector.multi_reduction <add>, %18, %cst_6 [1] : vector<8x128xf32> to vector<8xf32>
    %20 = vector.shape_cast %19 : vector<8xf32> to vector<8x1xf32>
    %21 = arith.addf %15, %20 : vector<8x1xf32>
    %c0_7 = arith.constant 0 : index
    %c0_8 = arith.constant 0 : index
    %22 = vector.load %arg6[%c0_7, %c0_8] : memref<8x1xf32, #tpu.memory_space<vmem>>, vector<8x1xf32>
    tpu.vector_store %arg6[%c0_7, %c0_8], %21 {strides = array<i32>} : memref<8x1xf32, #tpu.memory_space<vmem>>, vector<8x1xf32>,
    %c0_9 = arith.constant 0 : index
    %c0_10 = arith.constant 0 : index
    %23 = vector.load %arg5[%c0_9, %c0_10] : memref<8x1xf32, #tpu.memory_space<vmem>>, vector<8x1xf32>
    tpu.vector_store %arg5[%c0_9, %c0_10], %11 {strides = array<i32>} : memref<8x1xf32, #tpu.memory_space<vmem>>, vector<8x1xf32>,
    %c0_11 = arith.constant 0 : index
    %c0_12 = arith.constant 0 : index
    %24 = vector.load %arg3[%c0_11, %c0_12] : memref<8x1xi32, #tpu.memory_space<vmem>>, vector<8x1xi32>
    %25 = vector.broadcast %24 : vector<8x1xi32> to vector<8x128xi32>
    %26 = arith.cmpi eq, %7, %25 : vector<8x128xi32>
    %c0_13 = arith.constant 0 : index
    %c0_14 = arith.constant 0 : index
    %27 = vector.load %arg7[%c0_13, %c0_14] : memref<8x1xf32, #tpu.memory_space<vmem>>, vector<8x1xf32>
    %cst_15 = arith.constant 0.000000e+00 : f32
    %28 = vector.broadcast %cst_15 : f32 to vector<8x128xf32>
    %29 = arith.select %26, %3, %28 : vector<8x128xi1>, vector<8x128xf32>
    %cst_16 = arith.constant dense<0.000000e+00> : vector<8xf32>
    %30 = vector.multi_reduction <add>, %29, %cst_16 [1] : vector<8x128xf32> to vector<8xf32>
    %31 = vector.shape_cast %30 : vector<8xf32> to vector<8x1xf32>
    %32 = arith.addf %27, %31 : vector<8x1xf32>
    %c0_17 = arith.constant 0 : index
    %c0_18 = arith.constant 0 : index
    %33 = vector.load %arg7[%c0_17, %c0_18] : memref<8x1xf32, #tpu.memory_space<vmem>>, vector<8x1xf32>
    tpu.vector_store %arg7[%c0_17, %c0_18], %32 {strides = array<i32>} : memref<8x1xf32, #tpu.memory_space<vmem>>, vector<8x1xf32>,
    %c2_i32 = arith.constant 2 : i32
    %34 = arith.cmpi eq, %arg1, %c2_i32 : i32
    %35 = arith.extui %34 : i1 to i32
    %c0_i32_19 = arith.constant 0 : i32
    %36 = arith.cmpi ne, %35, %c0_i32_19 : i32
    scf.if %36 {
      %c0_20 = arith.constant 0 : index
      %c0_21 = arith.constant 0 : index
      %37 = vector.load %arg5[%c0_20, %c0_21] : memref<8x1xf32, #tpu.memory_space<vmem>>, vector<8x1xf32>
      %c0_22 = arith.constant 0 : index
      %c0_23 = arith.constant 0 : index
      %38 = vector.load %arg6[%c0_22, %c0_23] : memref<8x1xf32, #tpu.memory_space<vmem>>, vector<8x1xf32>
      %39 = math.log %38 : vector<8x1xf32>
      %40 = arith.addf %37, %39 : vector<8x1xf32>
      %c0_24 = arith.constant 0 : index
      %c0_25 = arith.constant 0 : index
      %41 = vector.load %arg7[%c0_24, %c0_25] : memref<8x1xf32, #tpu.memory_space<vmem>>, vector<8x1xf32>
      %42 = arith.subf %40, %41 : vector<8x1xf32>
      %c0_26 = arith.constant 0 : index
      %c0_27 = arith.constant 0 : index
      %43 = vector.load %arg4[%c0_26, %c0_27] : memref<8x1xf32, #tpu.memory_space<vmem>>, vector<8x1xf32>
      tpu.vector_store %arg4[%c0_26, %c0_27], %42 {strides = array<i32>} : memref<8x1xf32, #tpu.memory_space<vmem>>, vector<8x1xf32>,
    } else {
    }
    return
  }
  func.func @transform_0(%arg0: i32, %arg1: i32) -> (i32, i32) {
    %c0_i32 = arith.constant 0 : i32
    return %arg0, %arg1 : i32, i32
  }
  func.func @transform_1(%arg0: i32, %arg1: i32) -> (i32, i32) {
    %c0_i32 = arith.constant 0 : i32
    %c0_i32_0 = arith.constant 0 : i32
    return %arg0, %c0_i32 : i32, i32
  }
  func.func @transform_2(%arg0: i32, %arg1: i32) -> (i32, i32) {
    %c0_i32 = arith.constant 0 : i32
    %c0_i32_0 = arith.constant 0 : i32
    return %arg0, %c0_i32 : i32, i32
  }
}

</mosaic_0001>

<bundles_post_ra>
// kernel: tpu_custom_call.1
= control target key start
LH: loop header
LB: loop body
LE: loop exit
PB: predicated region body
PF: predicated region fallthrough
CT: control target
= control target key end

     0   :  { %7 = vsyncpa [#allocation6], 0  ;;  %s626_s0 = inlined_call_operand.hbm [shape: f32[8,384], index: 0, kind: input, shape index: {}]   ;;  %s627_s1 = inlined_call_operand.vmem [shape: s32[8,1], index: 1, kind: input, shape index: {}]   ;;  %s628_s2 = inlined_call_operand.vmem [shape: f32[8,1], index: 2, kind: output, shape index: {}]  }
   0x1   :  { %9 = vsyncpa [#allocation6 + $0x1], 0  ;;  %s518_s9 = smov 0   ;;  %s520_s10 = smov 0  }
   0x2   :  { %s522_s11 = smov 0   ;;  %s524_s12 = smov 0  }
   0x3   :  { %s526_s13 = smov 0   ;;  %s528_s14 = smov 0  }
   0x4 LB: > { %s339_s15 = sadd.s32 4294967295, %s497_s14   ;;  %s24_s16 = sadd.s32 1, %s493_s13  ;;  %s497_s14 = sphi %s528_s14, %s15_s14   ;;  %s493_s13 = sphi %s526_s13, %s636_s13   ;;  %s489_s12 = sphi %s524_s12, %s635_s12   ;;  %s485_s11 = sphi %s522_s11, %s634_s11   ;;  %s481_s10 = sphi %s520_s10, %s633_s10   ;;  %s477_s9 = sphi %s518_s9, %s632_s9  }
   0x5   : > { %p25_p0 = scmp.ge.s32.totalorder %s24_s16, 3  ;;  %s36_s17 = sadd.s32 1, %s485_s11 }
   0x6   : > { %p43_p1 = scmp.ne.s32.totalorder %s485_s11, %s481_s10  ;;  %p44_p2 = scmp.eq.s32.totalorder %s497_s14, 0 }
   0x7   : > { %s638_s16 = smov (%p25_p0, %s24_s16), 0  ;;  %p49_p4 = scmp.ne.s32.totalorder %s481_s10, %s477_s9 }
   0x8   : > { %p554_p3 = por %p44_p2, %p43_p1  ;;  %s32_s19 = ssub.s32 %s493_s13, %s638_s16 }
   0x9   : > { %p50_p5 = scmp.eq.s32.totalorder %s339_s15, 0  ;;  %p34_p6 = scmp.eq.s32.totalorder %s32_s19, 0 }
   0xa   : > { %p359_p8 = scmp.lt.s32.totalorder %s497_s14, 3  ;;  %s132_s22 = sand.u32 1, %s485_s11  }
   0xb   : > { %p561_p7 = por %p50_p5, %p49_p4  ;;  %s344_s23 = sshll.u32 %s493_s13, 7 }
   0xc   : > { %s567_s21 = scalar_select %p34_p6, %s485_s11, %s36_s17  }
   0xd   : > { %s343_s24 = sshll.u32 %s132_s22, 3  ;;  %s143_s27 = scalar_lea.hbm %s626_s0, %s344_s23 }
   0xe   : > { %s136_s28 = scalar_lea.vmem [#allocation5], %s343_s24  ;;  %p576_p9 = pnand %p359_p8, %p554_p3 }
   0xf   : > { %s145_s29 = sshll.u32 %s136_s28, 4  ;;  %p345_p10 = scmp.ge.s32.totalorder %s497_s14, 1  ;;  %s146_s29 = int_to_ptr.vmem [resolvable:$true] %s145_s29 }
  0x10   : > { %p150_p11 = scmp.lt.s32.totalorder %s497_s14, 4  ;;  %s133_s3 = scalar_lea.sflag [#allocation6], %s132_s22 }
  0x11   : > { %p421_p12 = pneg %p576_p9  ;;  %s432_s4 = scalar_lea.vmem %s146_s29, 128 }
  0x12   : > { %p433_p13 = scmp.ne.s32.totalorder %s146_s29, %s432_s4  ;;  %s499_s5 = smov [#allocation5]  }
  0x13   : > { %s437_s6 = sshll.u32 %s499_s5, 4  ;;  %s438_s6 = int_to_ptr.vmem [resolvable:$false] %s437_s6 }
  0x14   : > { %p435_p0 = pnand %p433_p13, %p421_p12  ;;  %s439_s7 = scalar_lea.vmem %s438_s6, 256 }
  0x15   : > { %p440_p2 = scmp.lt.s32.totalorder %s146_s29, %s438_s6  ;;  %p441_p3 = scmp.lt.s32.totalorder %s439_s7, %s432_s4 }
  0x16   : > { %p436_p1 = pneg %p435_p0 }
  0x17   : > { %p442_p4 = por %p441_p3, %p440_p2 }
  0x19   : > { %p443_p5 = pnand %p442_p4, %p436_p1 }
  0x1b   : > { %446 = shalt.err (!%p443_p5)
}
  0x1c   : > { %358 = dma.hbm_to_vmem [thread:$0]  (!%p576_p9), %s143_s27, 128, %s146_s29, %s133_s3  }
  0x1d   : > { %p151_p6 = pnand %p345_p10, %p150_p11 }
  0x1e   : > { %s156_s8 = sand.u32 (!%p151_p6), 1, %s481_s10  }
  0x1f   : > { %154 = sbr.rel (%p151_p6) target bundleno = 499 (0x1f3), region = 28  ;;  %s346_s9 = sshll.u32 (!%p151_p6), %s156_s8, 3 }
  0x20   : > { %s157_s15 = scalar_lea.sflag (!%p151_p6), [#allocation6], %s156_s8  ;;  %s160_s17 = scalar_lea.vmem (!%p151_p6), [#allocation5], %s346_s9 }
  0x24   : > { %472 = dma.done.wait (%p561_p7), %s157_s15, 128  }
  0x25   : > { %474 = vsyncadd (%p561_p7), %s157_s15, 4294967168  ;;  %p347_p8 = scmp.ne.s32.totalorder %s489_s12, 0 }
  0x27   : > { %195 = sbr.rel (%p347_p8) target bundleno = 47 (0x2f), region = 36 }
  0x2c   : > { %vm196_vm0 = vcmask 7168   ;;  %v500_v0 = vmov -inf   ;;  %v501_v1 = vmov 0.0  }
  0x2d   : > { %197 = vst.msk [vmem:[#allocation2] sm:$0xff] %vm196_vm0, %v500_v0  ;;  %198 = vst.msk [vmem:[#allocation3] sm:$0xff] %vm196_vm0, %v501_v1 }
  0x2e   : > { %199 = vst.msk [vmem:[#allocation4] sm:$0xff] %vm196_vm0, %v501_v1 }
  0x2f PF: > { %v200_v2 = vld [vmem:[%s160_s17] sm:$0xff]  ;;  %v502_v3 = vmov 0   ;;  %vm226_vm1 = vcmask 7168   ;;  %v202_v12 = vlaneseq  ;;  %s348_s20 = sshll.u32 %s489_s12, 7  ;;  %p349_p7 = scmp.ne.s32.totalorder %s489_s12, 2 }
  0x30   : > { %207 = vmax.xlane.f32.xlu0 %v200_v2  ;;  %412 = vset.pattern.permute.xlu1 %v502_v3  ;;  %v229_v4 = vld [vmem:[%s627_s1] sm:$0xff]  ;;  %v204_v14 = vstv %s348_s20 }
  0x31   : > { %411 = vset.pattern.permute.xlu0 %v502_v3  ;;  %231 = vperm.xlu1 %412, %v229_v4   ;;  %v203_v13 = vand.u32 127, %v202_v12 }
  0x33   : > { %v205_v15 = vadd.s32 %v204_v14, %v203_v13 }
  0x34   : > { %v206_v5 = vld [vmem:[#allocation2] sm:$0xff]  ;;  %v213_v21 = vld [vmem:[#allocation3] sm:$0xff] }
  0x35   : > { %v234_v25 = vld [vmem:[#allocation4] sm:$0xff] }
  0xac   : > { %v232_v16 = vpop.permute.xlu1 %231 }
  0xad   : > { %vm233_vm2 = vcmp.eq.s32.totalorder %v205_v15, %v232_v16 }
  0xae   : > { %v235_v18 = vsel %vm233_vm2, %v200_v2, 0.0 }
  0xb9   : > { %v208_v6 = vpop.xlane.xlu0 %207 }
  0xba   : > { %v209_v7 = vmax.f32 %v206_v5, %v208_v6 }
  0xbc   : > { %v210_v8 = vsub.f32 %v206_v5, %v209_v7  ;;  %228 = vst.msk [vmem:[#allocation2] sm:$0xff] %vm226_vm1, %v209_v7  ;;  %217 = vperm.xlu0 %411, %v209_v7  }
  0xbe   : > { %v211_v19 = vmul.f32 1.442695, %v210_v8 }
 0x137   : > { %v218_v9 = vpop.permute.xlu0 %217 }
 0x138   : > { %v220_v10 = vsub.f32 %v200_v2, %v218_v9 }
 0x13a   : > { %v221_v11 = vmul.f32 1.442695, %v220_v10 }
 0x13c   : > { %413 = vpow2.f32 %v221_v11 }
 0x13d   : > { %415 = vpow2.f32 %v211_v19 }
 0x149   : > { %v414_v17 = vpop.eup %413 }
 0x14a   : > { %223 = vadd.xlane.f32.xlu1 %v414_v17  ;;  %v416_v20 = vpop.eup %415 }
 0x14b   : > { %v214_v22 = vmul.f32 %v416_v20, %v213_v21 }
 0x14e   : > { %236 = vadd.xlane.f32.xlu1 %v235_v18 }
 0x1d3   : > { %v224_v23 = vpop.xlane.xlu1 %223 }
 0x1d4   : > { %v225_v24 = vadd.f32 %v224_v23, %v214_v22 }
 0x1d6   : > { %227 = vst.msk [vmem:[#allocation3] sm:$0xff] %vm226_vm1, %v225_v24  ;;  %243 = sbr.rel (%p349_p7) target bundleno = 499 (0x1f3), region = 40 }
 0x1d7   : > { %v237_v26 = vpop.xlane.xlu1 %236 }
 0x1d8   : > { %v238_v27 = vadd.f32 %v237_v26, %v234_v25 }
 0x1da   : > { %239 = vst.msk [vmem:[#allocation4] sm:$0xff] %vm226_vm1, %v238_v27 }
 0x1db   : > { %v244_v30 = vld [vmem:[#allocation2] sm:$0xff] }
 0x1dd   : > { %v245_v28 = vld [vmem:[#allocation3] sm:$0xff] }
 0x1de   : > { %417 = vlog2.f32 %v245_v28 }
 0x1e1   : > { %v249_v32 = vld [vmem:[#allocation4] sm:$0xff] }
 0x1eb   : > { %v418_v29 = vpop.eup %417 }
 0x1ec   : > { %v247_v31 = vmul.f32 0.6931472, %v418_v29 }
 0x1ee   : > { %v248_v33 = vadd.f32 %v247_v31, %v244_v30 }
 0x1f0   : > { %v250_v34 = vsub.f32 %v248_v33, %v249_v32 }
 0x1f2   : > { %251 = vst.msk [vmem:[%s628_s2] sm:$0xff] %vm226_vm1, %v250_v34 }
 0x1f3 PF: > { %s15_s14 = sadd.s32 1, %s497_s14   ;;  %s632_s9 = smov %s481_s10 }
 0x1f4   : > { %p12_p9 = scmp.ge.s32.totalorder %s15_s14, 5   ;;  %s633_s10 = smov %s485_s11 }
 0x1f5   : > { %s634_s11 = smov %s567_s21  ;;  %s635_s12 = smov %s493_s13 }
 0x1f6   : > { %s636_s13 = smov %s638_s16  ;;  %14 = sbr.rel (!%p12_p9) target bundleno = 4 (0x4), region = 79 }
 0x1fb   :  { %271 = vsyncpa [#allocation6], 1 }
 0x1fc   :  { %273 = vsyncpa [#allocation6 + $0x1], 1 }

</bundles_post_ra>
